<compile_context>
chip_gen: v5e
topology: v5e:2x2
jax: 0.10.0
libtpu: 0.0.40
codegen_flags: <defaults>
</compile_context>

<pallas_src>
import math
import functools

import jax
import jax.numpy as jnp
from jax.experimental import pallas as pl
from jax.experimental.pallas import tpu as pltpu


def _bessel_kernel(d_ref, freq_ref, o_ref, *, norm_const):
    # d_ref:    (1, block_n)  distances, N on the lane axis
    # freq_ref: (R, 1)        frequencies column (resident every step)
    # o_ref:    (R, block_n)  lane-dense output tile
    d = d_ref[...]                                   # (1, bn)
    freq = freq_ref[...]                             # (R, 1)
    # norm_const / d via the EUP reciprocal (exact, off the VALU); done on the
    # (1, bn) row once, then broadcast over R — cheap vs the (R, bn) sin.
    scale = norm_const * pl.reciprocal(d, approx=False)   # (1, bn)
    o_ref[...] = (scale * jnp.sin(freq * d)).astype(o_ref.dtype)


def spherical_bessel_basis(
    d_scaled,
    frequencies,
    cutoff,
    *,
    block_n=8192,          # lanes per grid step (large tiles amortize per-step overhead)
    transposed_out=False,  # True -> return (R, N) lane-dense basis directly
    out_dtype=jnp.float32, # bf16 halves writeback on v6e/v7x if the consumer is bf16
):
    """d_scaled: (N,) float32, frequencies: (R,) float32 -> (N, R) (or (R, N))."""
    N = d_scaled.shape[0]
    R = frequencies.shape[0]
    norm_const = math.sqrt(2.0 / cutoff**3)

    # Pick an effective lane-tile: at most block_n, at least the (128-rounded)
    # problem size so tiny inputs are not over-padded.  Ragged N is handled by
    # padding distances with 1.0 (safe: padded columns are sliced off below).
    n_lane = ((N + 127) // 128) * 128
    bn = max(128, min(block_n, n_lane))
    n_pad = ((N + bn - 1) // bn) * bn

    d = d_scaled.astype(jnp.float32)
    if n_pad != N:
        d = jnp.pad(d, (0, n_pad - N), constant_values=1.0)
    d_row = d.reshape(1, n_pad)
    f_col = frequencies.astype(jnp.float32).reshape(R, 1)

    kernel = functools.partial(_bessel_kernel, norm_const=norm_const)

    out_t = pl.pallas_call(
        kernel,
        out_shape=jax.ShapeDtypeStruct((R, n_pad), out_dtype),
        grid_spec=pl.GridSpec(
            grid=(n_pad // bn,),
            in_specs=[
                pl.BlockSpec((1, bn), lambda i: (0, i)),   # distances row tile
                pl.BlockSpec((R, 1), lambda i: (0, 0)),    # frequencies (resident)
            ],
            out_specs=pl.BlockSpec((R, bn), lambda i: (0, i)),
        ),
        compiler_params=pltpu.CompilerParams(
            dimension_semantics=("parallel",),   # N-axis grid: megacore-shardable on v7x
        ),
    )(d_row, f_col)

    out_t = out_t[:, :N]
    if transposed_out:
        return out_t
    return out_t.T  # back to the PyTorch (N, R) convention


def reference(d_scaled, frequencies, cutoff):
    norm_const = math.sqrt(2.0 / cutoff**3)
    return norm_const / d_scaled[:, None] * jnp.sin(frequencies[None, :] * d_scaled[:, None])


if __name__ == "__main__":
    num_radial = 8
    cutoff = 6.0

    # Deterministic parameter init (matches nn.Parameter(pi * arange(1, num_radial+1))).
    frequencies = jnp.asarray(math.pi * jnp.arange(1, num_radial + 1, dtype=jnp.float32))

    key = jax.random.PRNGKey(0)

    # Case 1: lane-aligned N.
    N1 = 128
    d1 = jax.random.uniform(key, (N1,), dtype=jnp.float32, minval=0.05, maxval=1.0)
    out1 = jax.block_until_ready(spherical_bessel_basis(d1, frequencies, cutoff))
    ref1 = reference(d1, frequencies, cutoff)
    assert out1.shape == (N1, num_radial)
    assert jnp.allclose(out1, ref1, rtol=1e-5, atol=1e-5), "mismatch vs reference (N=128)"

    # Case 2: ragged N (exercises the padding / cdiv path).
    N2 = 300
    d2 = jax.random.uniform(jax.random.PRNGKey(1), (N2,), dtype=jnp.float32,
                            minval=0.05, maxval=1.0)
    out2 = jax.block_until_ready(spherical_bessel_basis(d2, frequencies, cutoff))
    ref2 = reference(d2, frequencies, cutoff)
    assert out2.shape == (N2, num_radial)
    assert jnp.allclose(out2, ref2, rtol=1e-5, atol=1e-5), "mismatch vs reference (N=300)"

    print("KERNEL_OK")
</pallas_src>

<mosaic_0001>
module attributes {stable_mosaic.version = 11 : i64} {
  func.func @_bessel_kernel(%arg0: i32, %arg1: memref<1x128xf32, #tpu.memory_space<vmem>>, %arg2: memref<8x1xf32, #tpu.memory_space<vmem>>, %arg3: memref<8x128xf32, #tpu.memory_space<vmem>>) attributes {dimension_semantics = [#tpu.dimension_semantics<parallel>], iteration_bounds = array<i64: 1>, scalar_prefetch = 0 : i64, scratch_operands = 0 : i64, tpu.core_type = #tpu.core_type<tc>, window_params = [{transform_indices = @transform_0, window_bounds = array<i64: 1, 128>}, {pipeline_mode = #tpu.pipeline_mode<synchronous>, transform_indices = @transform_1, window_bounds = array<i64: 8, 1>}, {transform_indices = @transform_2, window_bounds = array<i64: 8, 128>}]} {
    %c0 = arith.constant 0 : index
    %c0_0 = arith.constant 0 : index
    %0 = vector.load %arg1[%c0, %c0_0] : memref<1x128xf32, #tpu.memory_space<vmem>>, vector<1x128xf32>
    %c0_1 = arith.constant 0 : index
    %c0_2 = arith.constant 0 : index
    %1 = vector.load %arg2[%c0_1, %c0_2] : memref<8x1xf32, #tpu.memory_space<vmem>>, vector<8x1xf32>
    %2 = tpu.reciprocal %0 : vector<1x128xf32> -> vector<1x128xf32>
    %cst = arith.constant 0.0962250456 : f32
    %3 = vector.broadcast %cst : f32 to vector<1x128xf32>
    %4 = arith.mulf %3, %2 : vector<1x128xf32>
    %5 = vector.broadcast %1 : vector<8x1xf32> to vector<8x128xf32>
    %6 = vector.broadcast %0 : vector<1x128xf32> to vector<8x128xf32>
    %7 = arith.mulf %5, %6 : vector<8x128xf32>
    %8 = math.sin %7 : vector<8x128xf32>
    %9 = vector.broadcast %4 : vector<1x128xf32> to vector<8x128xf32>
    %10 = arith.mulf %9, %8 : vector<8x128xf32>
    %c0_3 = arith.constant 0 : index
    %c0_4 = arith.constant 0 : index
    %11 = vector.load %arg3[%c0_3, %c0_4] : memref<8x128xf32, #tpu.memory_space<vmem>>, vector<8x128xf32>
    tpu.vector_store %arg3[%c0_3, %c0_4], %10 {strides = array<i32>} : memref<8x128xf32, #tpu.memory_space<vmem>>, vector<8x128xf32>,
    return
  }
  func.func @transform_0(%arg0: i32) -> (i32, i32) {
    %c0_i32 = arith.constant 0 : i32
    %c0_i32_0 = arith.constant 0 : i32
    return %c0_i32, %arg0 : i32, i32
  }
  func.func @transform_1(%arg0: i32) -> (i32, i32) {
    %c0_i32 = arith.constant 0 : i32
    %c0_i32_0 = arith.constant 0 : i32
    %c0_i32_1 = arith.constant 0 : i32
    return %c0_i32, %c0_i32_0 : i32, i32
  }
  func.func @transform_2(%arg0: i32) -> (i32, i32) {
    %c0_i32 = arith.constant 0 : i32
    %c0_i32_0 = arith.constant 0 : i32
    return %c0_i32, %arg0 : i32, i32
  }
}

</mosaic_0001>

<bundles_post_ra>
// kernel: tpu_custom_call.1
= control target key start
LH: loop header
LB: loop body
LE: loop exit
PB: predicated region body
PF: predicated region fallthrough
CT: control target
= control target key end

     0   :  { %v255_v1 = vmov 0   ;;  %s359_s0 = inlined_call_operand.vmem [shape: f32[1,128], index: 0, kind: input, shape index: {}]   ;;  %s360_s1 = inlined_call_operand.vmem [shape: f32[8,1], index: 1, kind: input, shape index: {}]   ;;  %s361_s2 = inlined_call_operand.hbm [shape: f32[8,128], index: 2, kind: output, shape index: {}]  }
   0x1   :  { %v13_v0 = vld [vmem:[%s360_s1] sm:$0xff]  ;;  %225 = vset.pattern.permute.xlu0 %v255_v1 }
   0x2   :  { %31 = vperm.xlu0 %225, %v13_v0  }
   0x3   :  { %7 = vsyncpa [#allocation3], 0  ;;  %v226_v2 = vld [vmem:[%s359_s0] ss:$0 sm:$0xff]  ;;  %v256_v16 = vmov 683565275  }
   0x4   :  { %v257_v18 = vmov 2475754826   ;;  %v258_v21 = vmov 2131351028   ;;  %v259_v24 = vmov 2102212464  }
   0x5   :  { %v260_v27 = vmov 920167782   ;;  %v261_v30 = vmov 1326507024   ;;  %s205_s17 = sshll.u32 %s361_s2, 4  ;;  %s206_s17 = int_to_ptr.hbm [resolvable:$true] %s205_s17 }
  0x74   :  { %v32_v3 = vpop.permute.xlu0 %31 }
  0x75   :  { %v285_v4 = vmul.f32 %v226_v2, %v32_v3 }
  0x77   :  { %v41_v5 = vand.u32 2139095040, %v285_v4  ;;  %v38_v8 = vand.u32 2147483647, %v285_v4  ;;  %vm40_vm12 = vcmp.lt.s32.totalorder %v285_v4, 0 }
  0x79   :  { %v42_v6 = vshrl.u32 %v41_v5, 23  ;;  %v45_v10 = vand.u32 8388607, %v38_v8  ;;  %vm346_vm13 = vcmp.le.f32.partialorder %v38_v8, 0.7853982 }
  0x7b   :  { %v214_v7 = vadd.s32 4294967169, %v42_v6  ;;  %v46_v14 = vor.u32 8388608, %v45_v10 }
  0x7d   :  { %v48_v9 = vadd.s32 1, %v214_v7  ;;  %v302_v37 = vshll.u32 %v46_v14, 8 }
  0x7f   :  { %vm49_vm0 = vcmp.gt.s32.totalorder %v48_v9, 0  ;;  %v87_v46 = vand.u32 65535, %v302_v37  ;;  %v88_v47 = vshrl.u32 %v302_v37, 16 }
  0x80   :  { %v50_v11 = vsel %vm49_vm0, %v48_v9, 0 }
  0x81   :  { %v52_v12 = vand.u32 31, %v50_v11  ;;  %v293_v15 = vshrl.u32 %v50_v11, 5 }
  0x83   :  { %v291_v13 = vsub.s32 32, %v52_v12  ;;  %v55_v17 = vshll.u32 %v256_v16, %v52_v12  ;;  %v58_v19 = vshll.u32 %v257_v18, %v52_v12  ;;  %v61_v23 = vshll.u32 %v258_v21, %v52_v12 }
  0x84   :  { %v64_v26 = vshll.u32 %v259_v24, %v52_v12  ;;  %v67_v29 = vshll.u32 %v260_v27, %v52_v12  ;;  %vm70_vm1 = vcmp.lt.s32.totalorder %v293_v15, 1  ;;  %vm73_vm2 = vcmp.lt.s32.totalorder %v293_v15, 4 }
  0x85   :  { %v56_v20 = vshrl.u32 %v257_v18, %v291_v13  ;;  %v59_v22 = vshrl.u32 %v258_v21, %v291_v13  ;;  %v62_v25 = vshrl.u32 %v259_v24, %v291_v13  ;;  %v65_v28 = vshrl.u32 %v260_v27, %v291_v13 }
  0x86   :  { %v68_v31 = vshrl.u32 %v261_v30, %v291_v13  ;;  %vm72_vm3 = vcmp.lt.s32.totalorder %v293_v15, 3  ;;  %vm71_vm4 = vcmp.lt.s32.totalorder %v293_v15, 2  ;;  %v54_v11 = vshrl.u32 %v256_v16, %v291_v13  ;;  %v12_v15 = vld [vmem:[%s359_s0] sm:$0x1]  ;;  %s262_s0 = smov [#allocation2]  }
  0x87   :  { %v57_v32 = vor.u32 %v56_v20, %v55_v17  ;;  %v60_v33 = vor.u32 %v59_v22, %v58_v19  ;;  %v63_v34 = vor.u32 %v62_v25, %v61_v23  ;;  %v66_v35 = vor.u32 %v65_v28, %v64_v26  ;;  %s203_s14 = sshll.u32 %s262_s0, 4  ;;  %s204_s14 = int_to_ptr.vmem [resolvable:$true] %s203_s14 }
  0x88   :  { %v69_v36 = vor.u32 %v68_v31, %v67_v29  ;;  %227 = vrcp.f32 %v12_v15  ;;  %vm19_vm14 = vweird.f32 %v12_v15 }
  0x89   :  { %v78_v38 = vsel %vm70_vm1, %v57_v32, %v60_v33  ;;  %v82_v39 = vsel %vm70_vm1, %v60_v33, %v63_v34  ;;  %v79_v40 = vsel %vm73_vm2, %v66_v35, 920167782  ;;  %v75_v7 = vsel %vm73_vm2, %v63_v34, 2102212464 }
  0x8a   :  { %v83_v41 = vsel %vm73_vm2, %v69_v36, 1326507024  ;;  %v80_v42 = vsel %vm72_vm3, %v63_v34, %v79_v40  ;;  %v74_v20 = vsel %vm70_vm1, %v54_v11, %v57_v32  ;;  %v76_v21 = vsel %vm72_vm3, %v60_v33, %v75_v7 }
  0x8b   :  { %v84_v43 = vsel %vm72_vm3, %v66_v35, %v83_v41  ;;  %v81_v44 = vsel %vm71_vm4, %v78_v38, %v80_v42  ;;  %v77_v13 = vsel %vm71_vm4, %v74_v20, %v76_v21 }
  0x8c   :  { %v85_v45 = vsel %vm71_vm4, %v82_v39, %v84_v43  ;;  %v111_v50 = vand.u32 65535, %v81_v44  ;;  %v112_v51 = vshrl.u32 %v81_v44, 16  ;;  %v131_v28 = vmul.u32 %v302_v37, %v77_v13 }
  0x8d   :  { %v89_v48 = vand.u32 65535, %v85_v45  ;;  %v90_v49 = vshrl.u32 %v85_v45, 16 }
  0x8e   :  { %v114_v54 = vmul.u32 %v112_v51, %v87_v46  ;;  %v115_v55 = vmul.u32 %v111_v50, %v88_v47  ;;  %v113_v59 = vmul.u32 %v111_v50, %v87_v46  ;;  %v116_v63 = vmul.u32 %v112_v51, %v88_v47 }
  0x8f   :  { %v92_v52 = vmul.u32 %v90_v49, %v87_v46  ;;  %v93_v53 = vmul.u32 %v89_v48, %v88_v47  ;;  %v91_v56 = vmul.u32 %v89_v48, %v87_v46  ;;  %v94_v58 = vmul.u32 %v90_v49, %v88_v47  ;;  %v228_v46 = vpop.eup %227 }
  0x90   :  { %v117_v60 = vshll.u32 %v114_v54, 16  ;;  %v119_v2 = vshll.u32 %v115_v55, 16  ;;  %v118_v18 = vshrl.u32 %v114_v54, 16  ;;  %v120_v24 = vshrl.u32 %v115_v55, 16 }
  0x91   :  { %v95_v57 = vshll.u32 %v92_v52, 16  ;;  %v97_v61 = vshll.u32 %v93_v53, 16  ;;  %v96_v12 = vshrl.u32 %v92_v52, 16  ;;  %v98_v22 = vshrl.u32 %v93_v53, 16 }
  0x92   :  { %vm121_vm6 = vc.u32 %v113_v59, %v117_v60  ;;  %v123_v3 = vadd.s32 %v117_v60, %v113_v59  ;;  %v15_v50 = vmul.f32 %v228_v46, %v12_v15  ;;  %vm20_vm15 = vweird.f32 %v228_v46 }
  0x93   :  { %vm99_vm5 = vc.u32 %v91_v56, %v95_v57  ;;  %v101_v62 = vadd.s32 %v95_v57, %v91_v56  ;;  %v122_v6 = vsel %vm121_vm6, 1, %v255_v1  ;;  %vm21_vm0 = vmor %vm19_vm14, %vm20_vm15 }
  0x94   :  { %v100_v0 = vsel %vm99_vm5, 1, %v255_v1  ;;  %v124_v10 = vadd.s32 %v122_v6, %v116_v63  ;;  %vm125_vm8 = vc.u32 %v123_v3, %v119_v2  ;;  %v127_v27 = vadd.s32 %v123_v3, %v119_v2 }
  0x95   :  { %v102_v5 = vadd.s32 %v100_v0, %v94_v58  ;;  %vm103_vm7 = vc.u32 %v101_v62, %v97_v61  ;;  %v126_v17 = vsel %vm125_vm8, 1, %v255_v1  ;;  %v16_v54 = vsub.f32 1.0, %v15_v50 }
  0x96   :  { %v104_v9 = vsel %vm103_vm7, 1, %v255_v1  ;;  %v128_v19 = vadd.s32 %v126_v17, %v124_v10  ;;  %v25_v62 = vand.u32 2147483648, %v12_v15  ;;  %v23_v3 = vand.u32 2147483647, %v12_v15 }
  0x97   :  { %v106_v14 = vadd.s32 %v104_v9, %v102_v5  ;;  %v17_v59 = vmul.f32 %v228_v46, %v16_v54  ;;  %vm181_vm5 = vweird.f32 %v285_v4 }
  0x98   :  { %v129_v25 = vadd.s32 %v128_v19, %v118_v18  ;;  %v26_v7 = vor.u32 1.1754944e-38, %v25_v62  ;;  %vm24_vm1 = vcmp.eq.f32.partialorder %v23_v3, 8.507059e+37 }
  0x99   :  { %v107_v23 = vadd.s32 %v106_v14, %v96_v12  ;;  %v18_v2 = vadd.f32 %v228_v46, %v17_v59 }
  0x9a   :  { %v130_v16 = vadd.s32 %v129_v25, %v120_v24 }
  0x9b   :  { %v108_v26 = vadd.s32 %v107_v23, %v98_v22  ;;  %v22_v12 = vsel %vm21_vm0, %v228_v46, %v18_v2 }
  0x9c   :  { %v134_v1 = vadd.s32 1, %v130_v16  ;;  %v27_v19 = vsel %vm24_vm1, %v26_v7, %v22_v12 }
  0x9d   :  { %vm133_vm9 = vc.u32 %v108_v26, %v127_v27  ;;  %v132_v41 = vadd.s32 %v127_v27, %v108_v26  ;;  %v28_v24 = vmul.f32 0.096225046, %v27_v19 }
  0x9e   :  { %v135_v29 = vsel %vm133_vm9, %v134_v1, %v130_v16 }
  0x9f   :  { %v136_v30 = vadd.s32 %v135_v29, %v131_v28  ;;  %v194_v16 = vperm.slane %v28_v24, 0 }
  0xa1   :  { %v137_v31 = vadd.s32 536870912, %v136_v30 }
  0xa3   :  { %v138_v32 = vshrl.u32 %v137_v31, 30 }
  0xa5   :  { %v139_v34 = vshll.u32 %v138_v32, 30  ;;  %v162_v60 = vsub.s32 4, %v138_v32 }
  0xa7   :  { %v140_v33 = vsub.s32 %v136_v30, %v139_v34  ;;  %v163_v5 = vsel %vm40_vm12, %v162_v60, %v138_v32 }
  0xa8   :  { %v165_v9 = vsel %vm346_vm13, 0, %v163_v5 }
  0xa9   :  { %vm141_vm10 = vcmp.lt.s32.totalorder %v140_v33, 0  ;;  %v142_v35 = vsub.s32 0, %v140_v33  ;;  %v182_v18 = vadd.s32 3, %v165_v9 }
  0xab   :  { %v143_v36 = vsel %vm141_vm10, %v142_v35, %v140_v33  ;;  %v183_v25 = vand.u32 3, %v182_v18 }
  0xac   :  { %v144_v38 = vclz %v143_v36 }
  0xad   :  { %vm185_vm2 = vcmp.eq.s32.totalorder %v183_v25, 0  ;;  %vm188_vm3 = vcmp.eq.s32.totalorder %v183_v25, 2  ;;  %vm184_vm4 = vcmp.lt.s32.totalorder %v183_v25, 2 }
  0xae   :  { %v215_v39 = vadd.s32 4294967294, %v144_v38 }
  0xb0   :  { %vm216_vm11 = vcmp.lt.s32.totalorder %v215_v39, 0 }
  0xb1   :  { %v147_v40 = vsel %vm216_vm11, 0, %v215_v39 }
  0xb2   :  { %v148_v37 = vsub.s32 32, %v147_v40  ;;  %v152_v42 = vsub.s32 4294967266, %v147_v40  ;;  %v149_v43 = vshll.u32 %v140_v33, %v147_v40 }
  0xb4   :  { %v150_v44 = vshrl.u32 %v132_v41, %v148_v37  ;;  %v153_v45 = vadd.s32 127, %v152_v42 }
  0xb6   :  { %v151_v47 = vor.u32 %v150_v44, %v149_v43  ;;  %v154_v48 = vshll.u32 %v153_v45, 23 }
  0xb8   :  { %v155_v49 = vor.u32 4788187, %v154_v48  ;;  %v158_v52 = vcvt.s32.f32 %v151_v47 }
  0xba   :  { %v156_v51 = vand.u32 2147483647, %v155_v49 }
  0xbc   :  { %v159_v53 = vmul.f32 %v158_v52, %v156_v51 }
  0xbe   :  { %v160_v55 = vxor.u32 2147483648, %v159_v53 }
  0xc0   :  { %v161_v57 = vsel %vm40_vm12, %v160_v55, %v159_v53 }
  0xc1   :  { %v164_v58 = vsel %vm346_vm13, %v285_v4, %v161_v57 }
  0xc2   :  { %v166_v61 = vmul.f32 %v164_v58, %v164_v58 }
  0xc4   :  { %v167_v63 = vmul.f32 -0.001358992, %v166_v61  ;;  %v174_v0 = vmul.f32 -0.00019511016, %v166_v61 }
  0xc6   :  { %v168_v8 = vadd.f32 0.041655596, %v167_v63  ;;  %v175_v6 = vadd.f32 0.008332121, %v174_v0 }
  0xc8   :  { %v169_v10 = vmul.f32 %v168_v8, %v166_v61  ;;  %v176_v11 = vmul.f32 %v175_v6, %v166_v61 }
  0xca   :  { %v170_v14 = vadd.f32 -0.4999988, %v169_v10  ;;  %v177_v17 = vadd.f32 -0.16666654, %v176_v11 }
  0xcc   :  { %v171_v20 = vmul.f32 %v170_v14, %v166_v61  ;;  %v178_v21 = vmul.f32 %v177_v17, %v166_v61 }
  0xce   :  { %v172_v22 = vadd.f32 1.0, %v171_v20  ;;  %v179_v23 = vadd.f32 1.0, %v178_v21 }
  0xd0   :  { %v180_v26 = vmul.f32 %v179_v23, %v164_v58  ;;  %v189_v27 = vxor.u32 2147483648, %v172_v22 }
  0xd2   :  { %v186_v13 = vxor.u32 2147483648, %v180_v26  ;;  %v190_v28 = vsel %vm188_vm3, %v189_v27, %v180_v26 }
  0xd4   :  { %v187_v1 = vsel %vm185_vm2, %v172_v22, %v186_v13 }
  0xd5   :  { %v191_v29 = vsel %vm184_vm4, %v187_v1, %v190_v28 }
  0xd6   :  { %v192_v30 = vsel %vm181_vm5, nan, %v191_v29 }
  0xd7   :  { %v196_v31 = vmul.f32 %v194_v16, %v192_v30 }
  0xd9   :  { %197 = vst [vmem:[#allocation2] sm:$0xff] %v196_v31 }
  0xda   :  { %208 = dma.vmem_to_hbm [thread:$0]  %s204_s14, 128, %s206_s17, [#allocation3]  }
  0xdb   :  { %253 = dma.done.wait [#allocation3], 128  }
  0xdc   :  { %254 = vsyncadd [#allocation3], 4294967168 }
  0xdd   :  { %213 = vsyncpa [#allocation3], 1 }

</bundles_post_ra>
